<compile_context>
chip_gen: v7x
topology: tpu7x:2x2x1
jax: 0.10.0
libtpu: 0.0.40
codegen_flags: <defaults>
</compile_context>

<pallas_src>
import jax
import jax.numpy as jnp
from jax.experimental import pallas as pl
from jax.experimental.pallas import tpu as pltpu


def _round_up(x, m):
    return ((x + m - 1) // m) * m


def _choose_tile(size, base, cap, waste_frac=0.05):
    """Return (tile, padded_size): tile % base == 0, tile <= max(cap, base),
    padded_size % tile == 0, padded_size >= size, with minimal zero padding
    (a few % extra padding is allowed only if it buys a much larger tile)."""
    padded = _round_up(size, base)
    cap = max(base, (cap // base) * base)
    if padded <= cap:
        return padded, padded
    # Largest tile (multiple of base, <= cap) dividing the base-padded extent.
    exact = base
    for tile in range(cap, base - 1, -base):
        if padded % tile == 0:
            exact = tile
            break
    # If divisibility forces a tiny tile, allow a small amount of extra
    # padding to get a bigger tile (less per-grid-step overhead).
    if exact * 2 <= cap:
        budget = max(base, int(waste_frac * padded))
        for tile in range(cap, exact, -base):
            p = _round_up(size, tile)
            if p - padded <= budget:
                return tile, p
    return exact, padded


def _tpu_config():
    """(tm_max, tn_max, tk_max, vmem_limit_bytes, num_parallel_cores)."""
    try:
        kind = jax.devices()[0].device_kind.lower()
    except Exception:
        kind = ""
    if "v7" in kind or "tpu7" in kind:
        # 3.2 TB/s HBM, 64 MiB VMEM, 2 TensorCores: ~4 MiB W tiles.
        return 256, 512, 2048, 48 * 1024 * 1024, 2
    if "v6" in kind:
        # 1.4 TB/s HBM, 128 MiB VMEM (32 MiB scoped default): ~4 MiB W tiles.
        return 256, 512, 2048, 64 * 1024 * 1024, 1
    if "v5" in kind:
        # 0.82 TB/s HBM, 16 MiB scoped default: 2 MiB W tiles are enough.
        return 256, 256, 2048, 32 * 1024 * 1024, 1
    # Unknown generation: conservative.
    return 256, 256, 2048, 32 * 1024 * 1024, 1


def _linear_kernel(x_ref, w_ref, b_ref, o_ref):
    """Grid = (K-split, M tiles, N tiles, K steps); K steps innermost.

    x_ref: (tm, tk)  activations
    w_ref: (tn, tk)  weight in native nn.Linear (out, in) layout
    b_ref: (1, tn)   bias
    o_ref: (tm, tn)  resident f32 output block == accumulator
    """
    s = pl.program_id(0)
    k = pl.program_id(3)

    @pl.when(k == 0)
    def _():
        bias_init = jnp.broadcast_to(b_ref[...], o_ref.shape).astype(o_ref.dtype)
        # Bias is folded only into K-split s == 0; other partials start at 0
        # and are summed in the wrapper.
        o_ref[...] = jnp.where(s == 0, bias_init, jnp.zeros_like(bias_init))

    # Contract dim 1 of both operands: (tm, tk) . (tn, tk)^T -> (tm, tn).
    # Mosaic handles the transposed RHS; the kernel is DMA-bound anyway.
    o_ref[...] += jax.lax.dot_general(
        x_ref[...],
        w_ref[...],
        dimension_numbers=(((1,), (1,)), ((), ())),
        preferred_element_type=jnp.float32,
    )


def linear_feature_extractor(x, weight, bias, *, compute_dtype=None):
    """
    x:      (B, C, H, W) float32  (flattened to (B, K) inside)
    weight: (output_size, input_size) float32  (PyTorch nn.Linear layout)
    bias:   (output_size,) float32
    returns (B, output_size) in x.dtype
    """
    B = x.shape[0]
    x2d = x.reshape(B, -1)                  # (B, K)
    K = x2d.shape[1]
    N, K_w = weight.shape
    assert K_w == K, "input_size mismatch after flatten"

    tm_max, tn_max, tk_max, vmem_limit, num_cores = _tpu_config()

    tm, m_pad = _choose_tile(B, 8, tm_max)
    tn, n_pad = _choose_tile(N, 128, tn_max)
    tk, k_pad = _choose_tile(K, 128, tk_max)

    m_tiles = m_pad // tm
    n_tiles = n_pad // tn
    k_steps_total = k_pad // tk

    # GEMV-shaped case on a multi-TensorCore part: split the K reduction so
    # both cores stream half of W; partials are summed in the wrapper.
    k_splits = 1
    if num_cores > 1 and m_tiles * n_tiles == 1 and k_steps_total >= 2 and k_steps_total % 2 == 0:
        k_splits = 2
    k_steps = k_steps_total // k_splits

    # Pad operands (no transpose of W).  NOTE: in production, pre-pad W/bias
    # once at parameter-init time; for 8/128-aligned shapes these are no-ops.
    x_p = x2d if (m_pad, k_pad) == (B, K) else jnp.pad(x2d, ((0, m_pad - B), (0, k_pad - K)))
    w_p = weight if (n_pad, k_pad) == (N, K) else jnp.pad(weight, ((0, n_pad - N), (0, k_pad - K)))
    b_p = bias if n_pad == N else jnp.pad(bias, (0, n_pad - N))
    b_p = b_p.reshape(1, n_pad)

    if compute_dtype is not None:           # opt-in bf16 weights/activations
        x_p = x_p.astype(compute_dtype)
        w_p = w_p.astype(compute_dtype)

    grid = (k_splits, m_tiles, n_tiles, k_steps)

    cost = pl.CostEstimate(
        flops=2 * m_pad * n_pad * k_pad,
        transcendentals=0,
        bytes_accessed=(
            m_pad * k_pad * x_p.dtype.itemsize
            + n_pad * k_pad * w_p.dtype.itemsize
            + n_pad * b_p.dtype.itemsize
            + k_splits * m_pad * n_pad * 4
        ),
    )

    # NOTE: x block index ignores j, so each x tile is re-streamed per N tile;
    # fine while B*K bytes << K*N bytes (the small-B / GEMV-shaped regime).
    out_padded = pl.pallas_call(
        _linear_kernel,
        out_shape=jax.ShapeDtypeStruct((k_splits, m_pad, n_pad), jnp.float32),
        grid_spec=pltpu.PrefetchScalarGridSpec(
            num_scalar_prefetch=0,
            grid=grid,
            in_specs=[
                pl.BlockSpec((tm, tk), lambda s, i, j, k: (i, s * k_steps + k)),  # x
                pl.BlockSpec((tn, tk), lambda s, i, j, k: (j, s * k_steps + k)),  # W (N,K)
                pl.BlockSpec((1, tn), lambda s, i, j, k: (0, j)),                 # bias
            ],
            out_specs=pl.BlockSpec((None, tm, tn), lambda s, i, j, k: (s, i, j)),
        ),
        compiler_params=pltpu.CompilerParams(
            dimension_semantics=("parallel", "parallel", "parallel", "arbitrary"),
            vmem_limit_bytes=vmem_limit,
        ),
        cost_estimate=cost,
    )(x_p, w_p, b_p)

    out2d = out_padded[0] if k_splits == 1 else jnp.sum(out_padded, axis=0)
    return out2d[:B, :N].astype(x.dtype)


# TODO(synk): `preconditioner=True` path uses a custom `Linear(input_size,
# output_size)` class (not defined in the module source) plus optional
# checkpoint loading; only the standard nn.Linear path is implemented.


if __name__ == "__main__":
    key = jax.random.PRNGKey(0)
    kx, kw, kb = jax.random.split(key, 3)

    # Small shapes consistent with the module: x is (B, C, H, W) -> flatten.
    B, C, H, W = 2, 4, 16, 16
    input_size = C * H * W          # 1024
    output_size = 32

    x = jax.random.normal(kx, (B, C, H, W), dtype=jnp.float32)

    # Deterministic nn.Linear-style init: U(-1/sqrt(in), 1/sqrt(in)).
    bound = 1.0 / jnp.sqrt(jnp.float32(input_size))
    weight = jax.random.uniform(
        kw, (output_size, input_size), minval=-bound, maxval=bound,
        dtype=jnp.float32)
    bias = jax.random.uniform(
        kb, (output_size,), minval=-bound, maxval=bound, dtype=jnp.float32)

    out = linear_feature_extractor(x, weight, bias)
    out = jax.block_until_ready(out)

    # Reference check in plain JAX.
    ref = x.reshape(B, -1) @ weight.T + bias
    assert out.shape == (B, output_size)
    assert jnp.allclose(out, ref, atol=1e-4, rtol=1e-4)

    print("KERNEL_OK")
</pallas_src>

<mosaic_0001>
module attributes {stable_mosaic.version = 11 : i64} {
  func.func @_linear_kernel(%arg0: i32, %arg1: i32, %arg2: i32, %arg3: i32, %arg4: memref<8x1024xf32, #tpu.memory_space<vmem>>, %arg5: memref<128x1024xf32, #tpu.memory_space<vmem>>, %arg6: memref<1x128xf32, #tpu.memory_space<vmem>>, %arg7: memref<1x8x128xf32, #tpu.memory_space<vmem>>) attributes {dimension_semantics = [#tpu.dimension_semantics<parallel>, #tpu.dimension_semantics<parallel>, #tpu.dimension_semantics<parallel>, #tpu.dimension_semantics<arbitrary>], iteration_bounds = array<i64: 1, 1, 1, 1>, scalar_prefetch = 0 : i64, scratch_operands = 0 : i64, tpu.core_type = #tpu.core_type<tc>, window_params = [{transform_indices = @transform_0, window_bounds = array<i64: 8, 1024>}, {transform_indices = @transform_1, window_bounds = array<i64: 128, 1024>}, {transform_indices = @transform_2, window_bounds = array<i64: 1, 128>}, {transform_indices = @transform_3, window_bounds = array<i64: 1, 8, 128>}]} {
    %c0_i32 = arith.constant 0 : i32
    %0 = arith.cmpi eq, %arg3, %c0_i32 : i32
    %1 = arith.extui %0 : i1 to i32
    %c0_i32_0 = arith.constant 0 : i32
    %2 = arith.cmpi ne, %1, %c0_i32_0 : i32
    scf.if %2 {
      %c0_10 = arith.constant 0 : index
      %c0_11 = arith.constant 0 : index
      %12 = vector.load %arg6[%c0_10, %c0_11] : memref<1x128xf32, #tpu.memory_space<vmem>>, vector<1x128xf32>
      %13 = vector.shape_cast %12 : vector<1x128xf32> to vector<1x128xf32>
      %14 = vector.broadcast %13 : vector<1x128xf32> to vector<8x128xf32>
      %c0_i32_12 = arith.constant 0 : i32
      %15 = arith.cmpi eq, %arg0, %c0_i32_12 : i32
      %cst_13 = arith.constant 0.000000e+00 : f32
      %16 = vector.broadcast %cst_13 : f32 to vector<8x128xf32>
      %17 = arith.select %15, %14, %16 : vector<8x128xf32>
      %c0_14 = arith.constant 0 : index
      %c0_15 = arith.constant 0 : index
      %c0_16 = arith.constant 0 : index
      %18 = vector.load %arg7[%c0_14, %c0_15, %c0_16] : memref<1x8x128xf32, #tpu.memory_space<vmem>>, vector<1x8x128xf32>
      %19 = vector.shape_cast %18 : vector<1x8x128xf32> to vector<8x128xf32>
      %20 = vector.shape_cast %17 : vector<8x128xf32> to vector<1x8x128xf32>
      tpu.vector_store %arg7[%c0_14, %c0_15, %c0_16], %20 {strides = array<i32>} : memref<1x8x128xf32, #tpu.memory_space<vmem>>, vector<1x8x128xf32>,
    } else {
    }
    %c0 = arith.constant 0 : index
    %c0_1 = arith.constant 0 : index
    %c0_2 = arith.constant 0 : index
    %3 = vector.load %arg7[%c0, %c0_1, %c0_2] : memref<1x8x128xf32, #tpu.memory_space<vmem>>, vector<1x8x128xf32>
    %4 = vector.shape_cast %3 : vector<1x8x128xf32> to vector<8x128xf32>
    %c0_3 = arith.constant 0 : index
    %c0_4 = arith.constant 0 : index
    %5 = vector.load %arg4[%c0_3, %c0_4] : memref<8x1024xf32, #tpu.memory_space<vmem>>, vector<8x1024xf32>
    %c0_5 = arith.constant 0 : index
    %c0_6 = arith.constant 0 : index
    %6 = vector.load %arg5[%c0_5, %c0_6] : memref<128x1024xf32, #tpu.memory_space<vmem>>, vector<128x1024xf32>
    %cst = arith.constant dense<0.000000e+00> : vector<8x128xf32>
    %7 = tpu.matmul %5, %6, %cst {dimension_numbers = #tpu.dot_dimension_numbers<[1], [1], [0], [0], [0, 0, 1, 0], [], []>} : vector<8x1024xf32>, vector<128x1024xf32>, vector<8x128xf32> -> vector<8x128xf32>
    %8 = arith.addf %4, %7 : vector<8x128xf32>
    %c0_7 = arith.constant 0 : index
    %c0_8 = arith.constant 0 : index
    %c0_9 = arith.constant 0 : index
    %9 = vector.load %arg7[%c0_7, %c0_8, %c0_9] : memref<1x8x128xf32, #tpu.memory_space<vmem>>, vector<1x8x128xf32>
    %10 = vector.shape_cast %9 : vector<1x8x128xf32> to vector<8x128xf32>
    %11 = vector.shape_cast %8 : vector<8x128xf32> to vector<1x8x128xf32>
    tpu.vector_store %arg7[%c0_7, %c0_8, %c0_9], %11 {strides = array<i32>} : memref<1x8x128xf32, #tpu.memory_space<vmem>>, vector<1x8x128xf32>,
    return
  }
  func.func @transform_0(%arg0: i32, %arg1: i32, %arg2: i32, %arg3: i32) -> (i32, i32) {
    %c1_i32 = arith.constant 1 : i32
    %0 = arith.muli %arg0, %c1_i32 : i32
    %1 = arith.addi %0, %arg3 : i32
    %c0_i32 = arith.constant 0 : i32
    return %arg1, %1 : i32, i32
  }
  func.func @transform_1(%arg0: i32, %arg1: i32, %arg2: i32, %arg3: i32) -> (i32, i32) {
    %c1_i32 = arith.constant 1 : i32
    %0 = arith.muli %arg0, %c1_i32 : i32
    %1 = arith.addi %0, %arg3 : i32
    %c0_i32 = arith.constant 0 : i32
    return %arg2, %1 : i32, i32
  }
  func.func @transform_2(%arg0: i32, %arg1: i32, %arg2: i32, %arg3: i32) -> (i32, i32) {
    %c0_i32 = arith.constant 0 : i32
    %c0_i32_0 = arith.constant 0 : i32
    return %c0_i32, %arg2 : i32, i32
  }
  func.func @transform_3(%arg0: i32, %arg1: i32, %arg2: i32, %arg3: i32) -> (i32, i32, i32) {
    %c0_i32 = arith.constant 0 : i32
    return %arg0, %arg1, %arg2 : i32, i32, i32
  }
}

</mosaic_0001>

<bundles_post_ra>
// kernel: tpu_custom_call.1
= control target key start
LH: loop header
LB: loop body
LE: loop exit
PB: predicated region body
PF: predicated region fallthrough
CT: control target
= control target key end

     0   :  { %8 = vsyncpa [#allocation3], 0  ;;  %s782_s0 = inlined_call_operand.hbm [shape: f32[8,1024], index: 0, kind: input, shape index: {}]   ;;  %s783_s1 = inlined_call_operand.hbm [shape: f32[128,1024], index: 1, kind: input, shape index: {}]   ;;  %s784_s2 = inlined_call_operand.vmem [shape: f32[1,128], index: 2, kind: input, shape index: {}]   ;;  %s785_s3 = inlined_call_operand.hbm [shape: f32[1,8,128], index: 3, kind: output, shape index: {}]  }
   0x1   :  { %9 = vsyncpa [#allocation6], 0 }
   0x2   :  { %10 = vsyncpa [#allocation4], 0  ;;  %s711_s12 = smov [#allocation2]   ;;  %s712_s14 = smov [#allocation5]  }
   0x3   :  { %s21_s13 = sshll.u32 %s711_s12, 4  ;;  %s34_s15 = sshll.u32 %s712_s14, 4  ;;  %s22_s13 = int_to_ptr.vmem [resolvable:$true] %s21_s13  ;;  %s736_s15 = int_to_ptr.vmem [resolvable:$true] %s34_s15 }
   0x4   :  { %s639_s18 = scalar_lea.hbm %s782_s0, 1024 }
   0x5   :  { %p640_p0 = scmp.ne.s32.totalorder %s782_s0, %s639_s18  ;;  %p643_p1 = scmp.lt.u32.totalorder %s639_s18, %s782_s0 }
   0x7   :  { %p645_p2 = pnand %p643_p1, %p640_p0 }
   0x9   :  { %648 = shalt.err (!%p645_p2)
}
   0xa   :  { %s649_s23 = scalar_lea.vmem %s22_s13, 1024  ;;  %p654_p4 = scmp.lt.s32.totalorder %s22_s13, %s22_s13 }
   0xb   :  { %p650_p3 = scmp.ne.s32.totalorder %s22_s13, %s649_s23  ;;  %p655_p5 = scmp.lt.s32.totalorder %s649_s23, %s649_s23 }
   0xd   :  { %p656_p6 = por %p655_p5, %p654_p4 }
   0xf   :  { %p657_p7 = pnand %p656_p6, %p650_p3 }
  0x11   :  { %660 = shalt.err (!%p657_p7)
}
  0x12   :  { %24 = dma.hbm_to_vmem [thread:$0]  %s782_s0, 1024, %s22_s13, [#allocation3]  }
  0x13   :  { %s661_s28 = scalar_lea.hbm %s783_s1, 16384 }
  0x14   :  { %p662_p8 = scmp.ne.s32.totalorder %s783_s1, %s661_s28  ;;  %p665_p9 = scmp.lt.u32.totalorder %s661_s28, %s783_s1 }
  0x16   :  { %p667_p10 = pnand %p665_p9, %p662_p8 }
  0x18   :  { %670 = shalt.err (!%p667_p10)
}
  0x19   :  { %s671_s6 = scalar_lea.vmem %s736_s15, 16384  ;;  %p676_p12 = scmp.lt.s32.totalorder %s736_s15, %s736_s15 }
  0x1a   :  { %p672_p11 = scmp.ne.s32.totalorder %s736_s15, %s671_s6  ;;  %p677_p13 = scmp.lt.s32.totalorder %s671_s6, %s671_s6 }
  0x1c   :  { %p678_p0 = por %p677_p13, %p676_p12 }
  0x1e   :  { %p679_p1 = pnand %p678_p0, %p672_p11 }
  0x20   :  { %682 = shalt.err (!%p679_p1)
}
  0x21   :  { %s713_s0 = smov 1024   ;;  %s714_s7 = smov 64  }
  0x22   :  { %40 = dma.hbm_to_vmem [thread:$0]  %s783_s1, 16384, %s736_s15, [#allocation6], %s713_s0, %s713_s0, %s714_s7  }
  0x23   :  { %705 = dma.done.wait [#allocation3], 1024  }
  0x24   :  { %706 = vsyncadd [#allocation3], 4294966272 }
  0x25   :  { %707 = dma.done.wait [#allocation6], 16384  }
  0x26   :  { %708 = vsyncadd [#allocation6], 4294950912  ;;  %v80_v0 = vld [vmem:[#allocation5 + $0x8] sm:$0xff]  ;;  %v79_v2 = vld [vmem:[#allocation5] sm:$0xff]  ;;  %s715_s11 = smov [#allocation7]  }
  0x27   :  { %v88_v1 = vld [vmem:[#allocation5 + $0x48] sm:$0xff]  ;;  %v87_v4 = vld [vmem:[#allocation5 + $0x40] sm:$0xff]  ;;  %v82_v5 = vld [vmem:[#allocation5 + $0x18] sm:$0xff]  ;;  %s495_s12 = sshll.u32 %s715_s11, 4  ;;  %s496_s12 = int_to_ptr.vmem [resolvable:$true] %s495_s12 }
  0x28   :  { %v506_v3 = vpack.c.bf16 %v88_v1, %v80_v0  ;;  %v90_v6 = vld [vmem:[#allocation5 + $0x58] sm:$0xff]  ;;  %v508_v7 = vpack.c.bf16 %v87_v4, %v79_v2  ;;  %v81_v9 = vld [vmem:[#allocation5 + $0x10] sm:$0xff]  ;;  %v96_v11 = vld [vmem:[#allocation5 + $0x88] sm:$0xff]  ;;  %s683_s13 = scalar_lea.vmem %s496_s12, 128  ;;  %p688_p3 = scmp.lt.s32.totalorder %s496_s12, %s496_s12 }
  0x29   :  { %v538_v8 = vpack.c.bf16 %v90_v6, %v82_v5  ;;  %v89_v10 = vld [vmem:[#allocation5 + $0x50] sm:$0xff]  ;;  %v104_v13 = vld [vmem:[#allocation5 + $0xc8] sm:$0xff]  ;;  %v98_v15 = vld [vmem:[#allocation5 + $0x98] sm:$0xff]  ;;  %p684_p2 = scmp.ne.s32.totalorder %s496_s12, %s683_s13  ;;  %p689_p4 = scmp.lt.s32.totalorder %s683_s13, %s683_s13 }
  0x2a   :  { %507 = vmatprep.subr.bf16.mxu0 %v506_v3  ;;  %v540_v12 = vpack.c.bf16 %v89_v10, %v81_v9  ;;  %v510_v14 = vpack.c.bf16 %v104_v13, %v96_v11  ;;  %v106_v16 = vld [vmem:[#allocation5 + $0xd8] sm:$0xff]  ;;  %v95_v17 = vld [vmem:[#allocation5 + $0x80] sm:$0xff]  ;;  %v97_v20 = vld [vmem:[#allocation5 + $0x90] sm:$0xff] }
  0x2b   :  { %509 = vmatpush1.bf16.xpose.msra.mxu0 %v508_v7  ;;  %539 = vmatprep.subr.bf16.mxu1 %v538_v8  ;;  %v103_v18 = vld [vmem:[#allocation5 + $0xc0] sm:$0xff]  ;;  %v542_v19 = vpack.c.bf16 %v106_v16, %v98_v15  ;;  %v105_v21 = vld [vmem:[#allocation5 + $0xd0] sm:$0xff]  ;;  %v112_v22 = vld [vmem:[#allocation5 + $0x108] sm:$0xff]  ;;  %p690_p5 = por %p689_p4, %p688_p3 }
  0x2c   :  { %541 = vmatpush1.bf16.xpose.msra.mxu1 %v540_v12  ;;  %511 = vmatprep.subr.bf16.mxu0 %v510_v14  ;;  %v120_v23 = vld [vmem:[#allocation5 + $0x148] sm:$0xff]  ;;  %v114_v24 = vld [vmem:[#allocation5 + $0x118] sm:$0xff]  ;;  %v512_v26 = vpack.c.bf16 %v103_v18, %v95_v17  ;;  %v544_v27 = vpack.c.bf16 %v105_v21, %v97_v20  ;;  %v111_v30 = vld [vmem:[#allocation5 + $0x100] sm:$0xff] }
  0x2d   :  { %543 = vmatprep.subr.bf16.mxu1 %v542_v19  ;;  %v122_v25 = vld [vmem:[#allocation5 + $0x158] sm:$0xff]  ;;  %v514_v28 = vpack.c.bf16 %v120_v23, %v112_v22  ;;  %v119_v31 = vld [vmem:[#allocation5 + $0x140] sm:$0xff]  ;;  %v113_v32 = vld [vmem:[#allocation5 + $0x110] sm:$0xff]  ;;  %p691_p6 = pnand %p690_p5, %p684_p2 }
  0x2e   :  { %v546_v29 = vpack.c.bf16 %v122_v25, %v114_v24  ;;  %v121_v33 = vld [vmem:[#allocation5 + $0x150] sm:$0xff]  ;;  %v128_v34 = vld [vmem:[#allocation5 + $0x188] sm:$0xff]  ;;  %v130_v36 = vld [vmem:[#allocation5 + $0x198] sm:$0xff]  ;;  %v516_v38 = vpack.c.bf16 %v119_v31, %v111_v30 }
  0x2f   :  { %v136_v35 = vld [vmem:[#allocation5 + $0x1c8] sm:$0xff]  ;;  %v138_v37 = vld [vmem:[#allocation5 + $0x1d8] sm:$0xff]  ;;  %v548_v39 = vpack.c.bf16 %v121_v33, %v113_v32  ;;  %v127_v42 = vld [vmem:[#allocation5 + $0x180] sm:$0xff] }
  0x30   :  { %v518_v40 = vpack.c.bf16 %v136_v35, %v128_v34  ;;  %v550_v41 = vpack.c.bf16 %v138_v37, %v130_v36  ;;  %v135_v43 = vld [vmem:[#allocation5 + $0x1c0] sm:$0xff]  ;;  %v129_v44 = vld [vmem:[#allocation5 + $0x190] sm:$0xff]  ;;  %v72_v46 = vld [vmem:[#allocation2 + $0x8] sm:$0xff] }
  0x31   :  { %v137_v45 = vld [vmem:[#allocation5 + $0x1d0] sm:$0xff]  ;;  %v144_v47 = vld [vmem:[#allocation5 + $0x208] sm:$0xff]  ;;  %271 = vmatprep.mubr.f32.mxu0 %v72_v46  ;;  %v74_v49 = vld [vmem:[#allocation2 + $0x18] sm:$0xff]  ;;  %v520_v52 = vpack.c.bf16 %v135_v43, %v127_v42 }
  0x32   :  { %v152_v48 = vld [vmem:[#allocation5 + $0x248] sm:$0xff]  ;;  %v146_v50 = vld [vmem:[#allocation5 + $0x218] sm:$0xff]  ;;  %341 = vmatprep.mubr.f32.mxu1 %v74_v49  ;;  %v552_v53 = vpack.c.bf16 %v137_v45, %v129_v44  ;;  %v143_v56 = vld [vmem:[#allocation5 + $0x200] sm:$0xff] }
  0x33   :  { %513 = vmatpush1.bf16.xpose.msra.mxu0 %v512_v26  ;;  %v154_v51 = vld [vmem:[#allocation5 + $0x258] sm:$0xff]  ;;  %v522_v54 = vpack.c.bf16 %v152_v48, %v144_v47  ;;  %v151_v57 = vld [vmem:[#allocation5 + $0x240] sm:$0xff]  ;;  %v145_v58 = vld [vmem:[#allocation5 + $0x210] sm:$0xff] }
  0x34   :  { %545 = vmatpush1.bf16.xpose.msra.mxu1 %v544_v27  ;;  %515 = vmatprep.subr.bf16.mxu0 %v514_v28  ;;  %v554_v55 = vpack.c.bf16 %v154_v51, %v146_v50  ;;  %v153_v59 = vld [vmem:[#allocation5 + $0x250] sm:$0xff]  ;;  %v160_v60 = vld [vmem:[#allocation5 + $0x288] sm:$0xff]  ;;  %v162_v62 = vld [vmem:[#allocation5 + $0x298] sm:$0xff]  ;;  %v524_v0 = vpack.c.bf16 %v151_v57, %v143_v56 }
  0x35   :  { %547 = vmatprep.subr.bf16.mxu1 %v546_v29  ;;  %v168_v61 = vld [vmem:[#allocation5 + $0x2c8] sm:$0xff]  ;;  %v170_v63 = vld [vmem:[#allocation5 + $0x2d8] sm:$0xff]  ;;  %v556_v1 = vpack.c.bf16 %v153_v59, %v145_v58  ;;  %v159_v4 = vld [vmem:[#allocation5 + $0x280] sm:$0xff] }
  0x36   :  { %v526_v2 = vpack.c.bf16 %v168_v61, %v160_v60  ;;  %v558_v3 = vpack.c.bf16 %v170_v63, %v162_v62  ;;  %v167_v5 = vld [vmem:[#allocation5 + $0x2c0] sm:$0xff]  ;;  %v161_v6 = vld [vmem:[#allocation5 + $0x290] sm:$0xff]  ;;  %v176_v8 = vld [vmem:[#allocation5 + $0x308] sm:$0xff] }
  0x37   :  { %v169_v7 = vld [vmem:[#allocation5 + $0x2d0] sm:$0xff]  ;;  %v184_v9 = vld [vmem:[#allocation5 + $0x348] sm:$0xff]  ;;  %v178_v10 = vld [vmem:[#allocation5 + $0x318] sm:$0xff]  ;;  %v528_v12 = vpack.c.bf16 %v167_v5, %v159_v4 }
  0x38   :  { %v186_v11 = vld [vmem:[#allocation5 + $0x358] sm:$0xff]  ;;  %v560_v13 = vpack.c.bf16 %v169_v7, %v161_v6  ;;  %v530_v14 = vpack.c.bf16 %v184_v9, %v176_v8  ;;  %v175_v16 = vld [vmem:[#allocation5 + $0x300] sm:$0xff]  ;;  %v177_v18 = vld [vmem:[#allocation5 + $0x310] sm:$0xff] }
  0x39   :  { %v562_v15 = vpack.c.bf16 %v186_v11, %v178_v10  ;;  %v183_v17 = vld [vmem:[#allocation5 + $0x340] sm:$0xff]  ;;  %v185_v19 = vld [vmem:[#allocation5 + $0x350] sm:$0xff]  ;;  %v192_v20 = vld [vmem:[#allocation5 + $0x388] sm:$0xff] }
  0x3a   :  { %v200_v21 = vld [vmem:[#allocation5 + $0x3c8] sm:$0xff]  ;;  %v194_v22 = vld [vmem:[#allocation5 + $0x398] sm:$0xff]  ;;  %v532_v24 = vpack.c.bf16 %v183_v17, %v175_v16  ;;  %v564_v25 = vpack.c.bf16 %v185_v19, %v177_v18  ;;  %v191_v28 = vld [vmem:[#allocation5 + $0x380] sm:$0xff] }
  0x3b   :  { %517 = vmatpush1.bf16.xpose.msra.mxu0 %v516_v38  ;;  %v202_v23 = vld [vmem:[#allocation5 + $0x3d8] sm:$0xff]  ;;  %v534_v26 = vpack.c.bf16 %v200_v21, %v192_v20  ;;  %v199_v29 = vld [vmem:[#allocation5 + $0x3c0] sm:$0xff]  ;;  %v193_v30 = vld [vmem:[#allocation5 + $0x390] sm:$0xff] }
  0x3c   :  { %549 = vmatpush1.bf16.xpose.msra.mxu1 %v548_v39  ;;  %519 = vmatprep.subr.bf16.mxu0 %v518_v40  ;;  %v566_v27 = vpack.c.bf16 %v202_v23, %v194_v22  ;;  %v201_v31 = vld [vmem:[#allocation5 + $0x3d0] sm:$0xff]  ;;  %v84_v32 = vld [vmem:[#allocation5 + $0x28] sm:$0xff]  ;;  %v86_v34 = vld [vmem:[#allocation5 + $0x38] sm:$0xff]  ;;  %v536_v36 = vpack.c.bf16 %v199_v29, %v191_v28 }
  0x3d   :  { %551 = vmatprep.subr.bf16.mxu1 %v550_v41  ;;  %v92_v33 = vld [vmem:[#allocation5 + $0x68] sm:$0xff]  ;;  %v94_v35 = vld [vmem:[#allocation5 + $0x78] sm:$0xff]  ;;  %v568_v37 = vpack.c.bf16 %v201_v31, %v193_v30  ;;  %v83_v40 = vld [vmem:[#allocation5 + $0x20] sm:$0xff] }
  0x3e   :  { %v570_v38 = vpack.c.bf16 %v92_v33, %v84_v32  ;;  %v602_v39 = vpack.c.bf16 %v94_v35, %v86_v34  ;;  %v91_v41 = vld [vmem:[#allocation5 + $0x60] sm:$0xff]  ;;  %v85_v42 = vld [vmem:[#allocation5 + $0x30] sm:$0xff]  ;;  %v100_v44 = vld [vmem:[#allocation5 + $0xa8] sm:$0xff] }
  0x3f   :  { %v93_v43 = vld [vmem:[#allocation5 + $0x70] sm:$0xff]  ;;  %v108_v45 = vld [vmem:[#allocation5 + $0xe8] sm:$0xff]  ;;  %v102_v46 = vld [vmem:[#allocation5 + $0xb8] sm:$0xff]  ;;  %v572_v49 = vpack.c.bf16 %v91_v41, %v83_v40 }
  0x40   :  { %v110_v47 = vld [vmem:[#allocation5 + $0xf8] sm:$0xff]  ;;  %v71_v48 = vld [vmem:[#allocation2] sm:$0xff]  ;;  %v73_v50 = vld [vmem:[#allocation2 + $0x10] sm:$0xff]  ;;  %v604_v51 = vpack.c.bf16 %v93_v43, %v85_v42 }
  0x41   :  { %v99_v56 = vld [vmem:[#allocation5 + $0xa0] sm:$0xff]  ;;  %v101_v58 = vld [vmem:[#allocation5 + $0xb0] sm:$0xff]  ;;  %v116_v60 = vld [vmem:[#allocation5 + $0x128] sm:$0xff] }
  0x42   :  { %v107_v57 = vld [vmem:[#allocation5 + $0xe0] sm:$0xff]  ;;  %v109_v59 = vld [vmem:[#allocation5 + $0xf0] sm:$0xff]  ;;  %v124_v61 = vld [vmem:[#allocation5 + $0x168] sm:$0xff] }
  0x43   :  { %521 = vmatpush1.bf16.xpose.msra.mxu0 %v520_v52  ;;  %v574_v52 = vpack.c.bf16 %v108_v45, %v100_v44  ;;  %v118_v62 = vld [vmem:[#allocation5 + $0x138] sm:$0xff]  ;;  %v115_v4 = vld [vmem:[#allocation5 + $0x120] sm:$0xff]  ;;  %v117_v6 = vld [vmem:[#allocation5 + $0x130] sm:$0xff] }
  0x44   :  { %553 = vmatpush1.bf16.xpose.msra.mxu1 %v552_v53  ;;  %523 = vmatprep.subr.bf16.mxu0 %v522_v54  ;;  %v606_v53 = vpack.c.bf16 %v110_v47, %v102_v46  ;;  %v76_v54 = vld [vmem:[#allocation2 + $0x28] sm:$0xff]  ;;  %v126_v63 = vld [vmem:[#allocation5 + $0x178] sm:$0xff]  ;;  %v123_v5 = vld [vmem:[#allocation5 + $0x160] sm:$0xff] }
  0x45   :  { %555 = vmatprep.subr.bf16.mxu1 %v554_v55  ;;  %v78_v55 = vld [vmem:[#allocation2 + $0x38] sm:$0xff]  ;;  %v125_v7 = vld [vmem:[#allocation5 + $0x170] sm:$0xff]  ;;  %v132_v8 = vld [vmem:[#allocation5 + $0x1a8] sm:$0xff] }
  0x46   :  { %v140_v9 = vld [vmem:[#allocation5 + $0x1e8] sm:$0xff]  ;;  %v134_v10 = vld [vmem:[#allocation5 + $0x1b8] sm:$0xff]  ;;  %v131_v16 = vld [vmem:[#allocation5 + $0x1a0] sm:$0xff] }
  0x47   :  { %v142_v11 = vld [vmem:[#allocation5 + $0x1f8] sm:$0xff]  ;;  %v139_v17 = vld [vmem:[#allocation5 + $0x1e0] sm:$0xff]  ;;  %v133_v18 = vld [vmem:[#allocation5 + $0x1b0] sm:$0xff] }
  0x48   :  { %v141_v19 = vld [vmem:[#allocation5 + $0x1f0] sm:$0xff]  ;;  %v148_v20 = vld [vmem:[#allocation5 + $0x228] sm:$0xff]  ;;  %v150_v22 = vld [vmem:[#allocation5 + $0x238] sm:$0xff] }
  0x49   :  { %v156_v21 = vld [vmem:[#allocation5 + $0x268] sm:$0xff]  ;;  %v158_v23 = vld [vmem:[#allocation5 + $0x278] sm:$0xff]  ;;  %v147_v28 = vld [vmem:[#allocation5 + $0x220] sm:$0xff] }
  0x4a   :  { %v155_v29 = vld [vmem:[#allocation5 + $0x260] sm:$0xff]  ;;  %v149_v30 = vld [vmem:[#allocation5 + $0x230] sm:$0xff]  ;;  %v164_v32 = vld [vmem:[#allocation5 + $0x2a8] sm:$0xff] }
  0x4b   :  { %525 = vmatpush1.bf16.xpose.msra.mxu0 %v524_v0  ;;  %v576_v0 = vpack.c.bf16 %v107_v57, %v99_v56  ;;  %v157_v31 = vld [vmem:[#allocation5 + $0x270] sm:$0xff]  ;;  %v172_v33 = vld [vmem:[#allocation5 + $0x2e8] sm:$0xff]  ;;  %v166_v34 = vld [vmem:[#allocation5 + $0x2b8] sm:$0xff] }
  0x4c   :  { %557 = vmatpush1.bf16.xpose.msra.mxu1 %v556_v1  ;;  %527 = vmatprep.subr.bf16.mxu0 %v526_v2  ;;  %v608_v1 = vpack.c.bf16 %v109_v59, %v101_v58  ;;  %v578_v2 = vpack.c.bf16 %v124_v61, %v116_v60  ;;  %v174_v35 = vld [vmem:[#allocation5 + $0x2f8] sm:$0xff]  ;;  %v163_v40 = vld [vmem:[#allocation5 + $0x2a0] sm:$0xff]  ;;  %v165_v42 = vld [vmem:[#allocation5 + $0x2b0] sm:$0xff] }
  0x4d   :  { %559 = vmatprep.subr.bf16.mxu1 %v558_v3  ;;  %v610_v3 = vpack.c.bf16 %v126_v63, %v118_v62  ;;  %v171_v41 = vld [vmem:[#allocation5 + $0x2e0] sm:$0xff]  ;;  %v173_v43 = vld [vmem:[#allocation5 + $0x2f0] sm:$0xff]  ;;  %v180_v44 = vld [vmem:[#allocation5 + $0x328] sm:$0xff] }
  0x4e   :  { %v188_v45 = vld [vmem:[#allocation5 + $0x368] sm:$0xff]  ;;  %v182_v46 = vld [vmem:[#allocation5 + $0x338] sm:$0xff] }
  0x4f   :  { %v190_v47 = vld [vmem:[#allocation5 + $0x378] sm:$0xff]  ;;  %v196_v56 = vld [vmem:[#allocation5 + $0x3a8] sm:$0xff] }
  0x50   :  { %v204_v57 = vld [vmem:[#allocation5 + $0x3e8] sm:$0xff]  ;;  %v198_v58 = vld [vmem:[#allocation5 + $0x3b8] sm:$0xff] }
  0x51   :  { %v206_v59 = vld [vmem:[#allocation5 + $0x3f8] sm:$0xff]  ;;  %v598_v62 = vpack.c.bf16 %v204_v57, %v196_v56 }
  0x52   :  { %v630_v63 = vpack.c.bf16 %v206_v59, %v198_v58 }
  0x53   :  { %529 = vmatpush1.bf16.xpose.msra.mxu0 %v528_v12  ;;  %v580_v12 = vpack.c.bf16 %v123_v5, %v115_v4 }
  0x54   :  { %561 = vmatpush1.bf16.xpose.msra.mxu1 %v560_v13  ;;  %531 = vmatprep.subr.bf16.mxu0 %v530_v14  ;;  %v612_v13 = vpack.c.bf16 %v125_v7, %v117_v6  ;;  %v582_v14 = vpack.c.bf16 %v140_v9, %v132_v8  ;;  %v75_v6 = vld [vmem:[#allocation2 + $0x20] sm:$0xff]  ;;  %v77_v7 = vld [vmem:[#allocation2 + $0x30] sm:$0xff] }
  0x55   :  { %563 = vmatprep.subr.bf16.mxu1 %v562_v15  ;;  %v614_v15 = vpack.c.bf16 %v142_v11, %v134_v10 }
  0x5b   :  { %533 = vmatpush1.bf16.xpose.msra.mxu0 %v532_v24  ;;  %v584_v24 = vpack.c.bf16 %v139_v17, %v131_v16  ;;  %v505_v17 = vld [vmem:[%s784_s2] ss:$0 sm:$0xff] }
  0x5c   :  { %565 = vmatpush1.bf16.xpose.msra.mxu1 %v564_v25  ;;  %535 = vmatprep.subr.bf16.mxu0 %v534_v26  ;;  %v616_v25 = vpack.c.bf16 %v141_v19, %v133_v18  ;;  %v586_v26 = vpack.c.bf16 %v156_v21, %v148_v20 }
  0x5d   :  { %567 = vmatprep.subr.bf16.mxu1 %v566_v27  ;;  %v618_v27 = vpack.c.bf16 %v158_v23, %v150_v22 }
  0x63   :  { %537 = vmatpush1.bf16.xpose.msra.mxu0 %v536_v36  ;;  %v588_v36 = vpack.c.bf16 %v155_v29, %v147_v28 }
  0x64   :  { %569 = vmatpush1.bf16.xpose.msra.mxu1 %v568_v37  ;;  %571 = vmatprep.subr.bf16.mxu0 %v570_v38  ;;  %v620_v37 = vpack.c.bf16 %v157_v31, %v149_v30  ;;  %v590_v38 = vpack.c.bf16 %v172_v33, %v164_v32 }
  0x65   :  { %603 = vmatprep.subr.bf16.mxu1 %v602_v39  ;;  %v622_v39 = vpack.c.bf16 %v174_v35, %v166_v34 }
  0x6a   :  { %272 = vmatmul.mubr.f32.vlgmr.msra.gmra.mrb[0].mxu0 %v71_v48  ;;  %v592_v48 = vpack.c.bf16 %v171_v41, %v163_v40 }
  0x6b   :  { %342 = vmatmul.mubr.f32.vlgmr.msra.gmra.mrb[0].mxu1 %v73_v50  ;;  %573 = vmatpush1.bf16.xpose.msra.mxu0 %v572_v49  ;;  %v624_v49 = vpack.c.bf16 %v173_v43, %v165_v42  ;;  %v594_v50 = vpack.c.bf16 %v188_v45, %v180_v44 }
  0x6c   :  { %605 = vmatpush1.bf16.xpose.msra.mxu1 %v604_v51  ;;  %575 = vmatprep.subr.bf16.mxu0 %v574_v52  ;;  %v626_v51 = vpack.c.bf16 %v190_v47, %v182_v46  ;;  %v179_v52 = vld [vmem:[#allocation5 + $0x320] sm:$0xff] }
  0x6d   :  { %607 = vmatprep.subr.bf16.mxu1 %v606_v53  ;;  %411 = vmatprep.mubr.f32.mxu0 %v76_v54  ;;  %v187_v53 = vld [vmem:[#allocation5 + $0x360] sm:$0xff]  ;;  %v181_v54 = vld [vmem:[#allocation5 + $0x330] sm:$0xff] }
  0x6e   :  { %481 = vmatprep.mubr.f32.mxu1 %v78_v55  ;;  %v189_v55 = vld [vmem:[#allocation5 + $0x370] sm:$0xff]  ;;  %v596_v60 = vpack.c.bf16 %v187_v53, %v179_v52 }
  0x6f   :  { %v628_v61 = vpack.c.bf16 %v189_v55, %v181_v54 }
  0x73   :  { %577 = vmatpush1.bf16.xpose.msra.mxu0 %v576_v0  ;;  %v195_v0 = vld [vmem:[#allocation5 + $0x3a0] sm:$0xff] }
  0x74   :  { %609 = vmatpush1.bf16.xpose.msra.mxu1 %v608_v1  ;;  %579 = vmatprep.subr.bf16.mxu0 %v578_v2  ;;  %v203_v1 = vld [vmem:[#allocation5 + $0x3e0] sm:$0xff]  ;;  %v197_v2 = vld [vmem:[#allocation5 + $0x3b0] sm:$0xff] }
  0x75   :  { %611 = vmatprep.subr.bf16.mxu1 %v610_v3  ;;  %v205_v3 = vld [vmem:[#allocation5 + $0x3f0] sm:$0xff]  ;;  %v600_v4 = vpack.c.bf16 %v203_v1, %v195_v0 }
  0x76   :  { %v632_v5 = vpack.c.bf16 %v205_v3, %v197_v2 }
  0x7b   :  { %581 = vmatpush1.bf16.xpose.msra.mxu0 %v580_v12 }
  0x7c   :  { %613 = vmatpush1.bf16.xpose.msra.mxu1 %v612_v13  ;;  %583 = vmatprep.subr.bf16.mxu0 %v582_v14 }
  0x7d   :  { %615 = vmatprep.subr.bf16.mxu1 %v614_v15 }
  0x83   :  { %585 = vmatpush1.bf16.xpose.msra.mxu0 %v584_v24 }
  0x84   :  { %617 = vmatpush1.bf16.xpose.msra.mxu1 %v616_v25  ;;  %587 = vmatprep.subr.bf16.mxu0 %v586_v26 }
  0x85   :  { %619 = vmatprep.subr.bf16.mxu1 %v618_v27 }
  0x8b   :  { %589 = vmatpush1.bf16.xpose.msra.mxu0 %v588_v36 }
  0x8c   :  { %621 = vmatpush1.bf16.xpose.msra.mxu1 %v620_v37  ;;  %591 = vmatprep.subr.bf16.mxu0 %v590_v38 }
  0x8d   :  { %623 = vmatprep.subr.bf16.mxu1 %v622_v39 }
  0x93   :  { %593 = vmatpush1.bf16.xpose.msra.mxu0 %v592_v48 }
  0x94   :  { %625 = vmatpush1.bf16.xpose.msra.mxu1 %v624_v49  ;;  %595 = vmatprep.subr.bf16.mxu0 %v594_v50 }
  0x95   :  { %627 = vmatprep.subr.bf16.mxu1 %v626_v51 }
  0x9b   :  { %597 = vmatpush1.bf16.xpose.msra.mxu0 %v596_v60 }
  0x9c   :  { %629 = vmatpush1.bf16.xpose.msra.mxu1 %v628_v61  ;;  %599 = vmatprep.subr.bf16.mxu0 %v598_v62 }
  0x9d   :  { %631 = vmatprep.subr.bf16.mxu1 %v630_v63 }
  0xa3   :  { %601 = vmatpush1.bf16.xpose.msra.mxu0 %v600_v4 }
  0xa4   :  { %633 = vmatpush1.bf16.xpose.msra.mxu1 %v632_v5 }
  0xaa   :  { %412 = vmatmul.mubr.f32.vlgmr.msra.gmra.mrb[2].mxu0 %v75_v6 }
  0xab   :  { %482 = vmatmul.mubr.f32.vlgmr.msra.gmra.mrb[2].mxu1 %v77_v7 }
 0x13d   :  { %v273_v8 = vpop.f32.mrb[0].mxu0 }
 0x13e   :  { %v275_v9 = vpop.f32.mrb[1].mxu0  ;;  %v343_v10 = vpop.f32.mrb[0].mxu1 }
 0x13f   :  { %v344_v11 = vadd.f32 %v343_v10, %v273_v8  ;;  %v345_v12 = vpop.f32.mrb[1].mxu1 }
 0x17d   :  { %v413_v13 = vpop.f32.mrb[2].mxu0 }
 0x17e   :  { %v414_v14 = vadd.f32 %v413_v13, %v344_v11  ;;  %v415_v15 = vpop.f32.mrb[3].mxu0  ;;  %v483_v16 = vpop.f32.mrb[2].mxu1 }
 0x17f   :  { %v485_v18 = vpop.f32.mrb[3].mxu1 }
 0x180   :  { %v484_v19 = vadd.f32 %v483_v16, %v414_v14 }
 0x182   :  { %v487_v20 = vadd.f32 %v505_v17, %v484_v19 }
 0x184   :  { %488 = vst [vmem:[#allocation7] sm:$0xff] %v487_v20 }
 0x185   :  { %694 = shalt.err (!%p691_p6)
}
 0x186   :  { %s695_s16 = scalar_lea.hbm %s785_s3, 128 }
 0x187   :  { %p696_p7 = scmp.ne.s32.totalorder %s785_s3, %s695_s16  ;;  %p699_p8 = scmp.lt.u32.totalorder %s695_s16, %s785_s3 }
 0x189   :  { %p701_p9 = pnand %p699_p8, %p696_p7 }
 0x18b   :  { %704 = shalt.err (!%p701_p9)
}
 0x18c   :  { %498 = dma.vmem_to_hbm [thread:$0]  %s496_s12, 128, %s785_s3, [#allocation4]  }
 0x18d   :  { %709 = dma.done.wait [#allocation4], 128  }
 0x18e   :  { %710 = vsyncadd [#allocation4], 4294967168 }
 0x18f   :  { %502 = vsyncpa [#allocation3], 1 }
 0x190   :  { %503 = vsyncpa [#allocation6], 1 }
 0x191   :  { %504 = vsyncpa [#allocation4], 1 }

</bundles_post_ra>
